<compile_context>
chip_gen: v6e
topology: v6e:2x2x1
jax: 0.10.0
libtpu: 0.0.40
codegen_flags: <defaults>
</compile_context>

<pallas_src>
import numpy as np
import jax
import jax.numpy as jnp
from jax.experimental import pallas as pl
from jax.experimental.pallas import tpu as pltpu


def _round_up(x, m):
    return (x + m - 1) // m * m


# ----------------------------------------------------------------------------
# Kernel A: hoisted input projection   pre = X @ W_ih^T   (all timesteps)
# ----------------------------------------------------------------------------
def _input_proj_kernel(x_ref, w_ref, o_ref):
    o_ref[...] = jnp.dot(
        x_ref[...], w_ref[...], preferred_element_type=jnp.float32
    ).astype(o_ref.dtype)


def input_proj_forward(x_flat, w_ih_t, *, out_dtype):
    """x_flat: (N, E), w_ih_t: (E, 4H)  ->  (N, 4H). Row-tiled, megacore-parallel."""
    N, E = x_flat.shape
    G = w_ih_t.shape[1]
    tm = N if N <= 512 else 512          # N is a multiple of 8 (padded batch)
    grid = (pl.cdiv(N, tm),)
    return pl.pallas_call(
        _input_proj_kernel,
        out_shape=jax.ShapeDtypeStruct((N, G), out_dtype),
        grid_spec=pltpu.PrefetchScalarGridSpec(
            num_scalar_prefetch=0,
            grid=grid,
            in_specs=[
                pl.BlockSpec((tm, E), lambda i: (i, 0)),
                pl.BlockSpec((E, G), lambda i: (0, 0)),
            ],
            out_specs=pl.BlockSpec((tm, G), lambda i: (i, 0)),
        ),
        compiler_params=pltpu.CompilerParams(
            dimension_semantics=("parallel",),
            vmem_limit_bytes=32 * 1024 * 1024,
        ),
        cost_estimate=pl.CostEstimate(
            flops=2 * N * E * G,
            transcendentals=0,
            bytes_accessed=N * E * x_flat.dtype.itemsize
            + E * G * w_ih_t.dtype.itemsize
            + N * G * jnp.dtype(out_dtype).itemsize,
        ),
    )(x_flat, w_ih_t)


# ----------------------------------------------------------------------------
# Kernel B: LSTM recurrence streamed over a (batch-block, time) grid
# ----------------------------------------------------------------------------
def _lstm_step_kernel(pre_ref, base_ref, whh_ref, hout_ref, h_sc, c_sc):
    # pre_ref : (1, tb, 4H)  input projection for this timestep's batch block
    # base_ref: (tb, 4H)     features @ W_ih^T + (b_ih + b_hh), f32 (constant block)
    # whh_ref : (H, 4H)      pre-transposed recurrent weights (constant block)
    # hout_ref: (1, tb, H)   hidden state for this (t, batch block)
    # h_sc/c_sc: (tb, H) f32 VMEM scratch carried across the time grid axis
    H = whh_ref.shape[0]
    t = pl.program_id(1)

    @pl.when(t == 0)
    def _():
        h_sc[...] = jnp.zeros_like(h_sc)
        c_sc[...] = jnp.zeros_like(c_sc)

    gates = (
        pre_ref[0].astype(jnp.float32)
        + base_ref[...]
        + jnp.dot(h_sc[...].astype(whh_ref.dtype), whh_ref[...],
                  preferred_element_type=jnp.float32)
    )  # (tb, 4H) f32

    # Gate columns pre-permuted in the wrapper to (i, f, o | g):
    # one sigmoid over the first 3H lanes, one tanh over the last H lanes.
    sig = jax.nn.sigmoid(gates[:, : 3 * H])
    i_g = sig[:, 0 * H:1 * H]
    f_g = sig[:, 1 * H:2 * H]
    o_g = sig[:, 2 * H:3 * H]
    g_g = jnp.tanh(gates[:, 3 * H:])

    c_new = f_g * c_sc[...] + i_g * g_g
    h_new = o_g * jnp.tanh(c_new)
    c_sc[...] = c_new
    h_sc[...] = h_new
    hout_ref[0] = h_new.astype(hout_ref.dtype)   # lane-dense (tb, H) store


def lstm_recurrence(pre_tb, base, w_hh_t, *, out_dtype):
    """pre_tb: (T, Bp, 4H); base: (Bp, 4H) f32; w_hh_t: (H, 4H) -> h: (T, Bp, H)."""
    T, Bp, G = pre_tb.shape
    H = w_hh_t.shape[0]
    tb = 256 if (Bp > 256 and Bp % 256 == 0) else Bp   # batch block (Bp % 8 == 0)
    nb = Bp // tb
    flops = T * (2 * Bp * H * G + 12 * Bp * H)
    return pl.pallas_call(
        _lstm_step_kernel,
        out_shape=jax.ShapeDtypeStruct((T, Bp, H), out_dtype),
        grid_spec=pltpu.PrefetchScalarGridSpec(
            num_scalar_prefetch=0,
            grid=(nb, T),     # batch blocks (parallel, v7x megacore) x time (serial)
            in_specs=[
                pl.BlockSpec((1, tb, G), lambda bb, t: (t, bb, 0)),
                pl.BlockSpec((tb, G), lambda bb, t: (bb, 0)),
                pl.BlockSpec((H, G), lambda bb, t: (0, 0)),
            ],
            out_specs=pl.BlockSpec((1, tb, H), lambda bb, t: (t, bb, 0)),
            scratch_shapes=[
                pltpu.VMEM((tb, H), jnp.float32),   # h carry (f32 for gate math)
                pltpu.VMEM((tb, H), jnp.float32),   # c carry
            ],
        ),
        compiler_params=pltpu.CompilerParams(
            dimension_semantics=("parallel", "arbitrary"),
            vmem_limit_bytes=32 * 1024 * 1024,
        ),
        cost_estimate=pl.CostEstimate(
            flops=flops,
            transcendentals=T * Bp * 5 * H,
            bytes_accessed=T * Bp * G * pre_tb.dtype.itemsize
            + Bp * G * base.dtype.itemsize
            + H * G * w_hh_t.dtype.itemsize
            + T * Bp * H * jnp.dtype(out_dtype).itemsize,
        ),
    )(pre_tb, base, w_hh_t)


# ----------------------------------------------------------------------------
# Kernel C: tiled linear projection to vocab (packed rows only)
# ----------------------------------------------------------------------------
def _linear_kernel(h_ref, w_ref, b_ref, o_ref):
    o_ref[...] = (
        jnp.dot(h_ref[...], w_ref[...], preferred_element_type=jnp.float32)
        + b_ref[...]
    ).astype(o_ref.dtype)


def linear_forward(h, w_lin_t, b_lin):
    """h: (N, H), w_lin_t: (H, V), b_lin: (1, V)  ->  (N, V) f32."""
    N, H = h.shape
    V = w_lin_t.shape[1]
    # Pad N up to the row-tile size instead of falling back to an awkward tm=N.
    n8 = _round_up(N, 8)
    tm = n8 if n8 <= 256 else 256
    Np = _round_up(N, tm)
    if Np != N:
        h = jnp.pad(h, ((0, Np - N), (0, 0)))
    # Lane-dense output tiles: tn a large multiple of 128 (unmasked vst).
    if V % 512 == 0:
        tn = 512
    elif V % 256 == 0:
        tn = 256
    elif V % 128 == 0:
        tn = 128
    else:
        tn = V   # small / odd vocab fallback: full-V block
    grid = (Np // tm, V // tn)   # vocab axis innermost -> LHS tile not re-DMAed per j
    out = pl.pallas_call(
        _linear_kernel,
        out_shape=jax.ShapeDtypeStruct((Np, V), jnp.float32),
        grid_spec=pltpu.PrefetchScalarGridSpec(
            num_scalar_prefetch=0,
            grid=grid,
            in_specs=[
                pl.BlockSpec((tm, H), lambda i, j: (i, 0)),
                pl.BlockSpec((H, tn), lambda i, j: (0, j)),
                pl.BlockSpec((1, tn), lambda i, j: (0, j)),
            ],
            out_specs=pl.BlockSpec((tm, tn), lambda i, j: (i, j)),
        ),
        compiler_params=pltpu.CompilerParams(
            dimension_semantics=("parallel", "parallel"),
            vmem_limit_bytes=32 * 1024 * 1024,
        ),
        cost_estimate=pl.CostEstimate(
            flops=2 * Np * H * V,
            transcendentals=0,
            bytes_accessed=Np * H * h.dtype.itemsize
            + H * V * w_lin_t.dtype.itemsize
            + 4 * V + 4 * Np * V,
        ),
    )(h, w_lin_t, b_lin)
    return out[:N] if Np != N else out


# ----------------------------------------------------------------------------
# DecoderRNN forward (glue + Pallas hot path)
# ----------------------------------------------------------------------------
def decoder_rnn_forward(params, features, captions, lengths, *,
                        matmul_dtype=jnp.bfloat16):
    """features: (B, E) f32, captions: (B, T) i32, lengths: python list (sorted desc).

    Returns packed logits (sum(lengths), V) ==
    linear(lstm(pack_padded_sequence(dropout(embed(captions)) + features)).data).
    """
    B, T = captions.shape
    E = params["embed"].shape[1]
    H = params["w_hh"].shape[1]
    G = 4 * H

    # --- one-time weight prep (XLA constant-folds for fixed params) ----------
    # Pre-transpose once; permute gate columns (i,f,g,o) -> (i,f,o,g) so the
    # kernel issues one sigmoid over [:, :3H] and one tanh over [:, 3H:].
    perm = np.concatenate([np.arange(0, 2 * H), np.arange(3 * H, 4 * H),
                           np.arange(2 * H, 3 * H)]).astype(np.int32)
    w_ih_t = params["w_ih"].T[:, perm]       # (E, 4H)
    w_hh_t = params["w_hh"].T[:, perm]       # (H, 4H)
    b_lstm = params["b_lstm"][:, perm]       # (1, 4H)  (b_ih + b_hh folded)
    w_lin_t = params["w_lin"].T              # (H, V)

    # --- pad batch to a multiple of 8 sublanes (full-vreg, unmasked stores) --
    Bp = _round_up(max(B, 8), 8)
    if Bp != B:
        features = jnp.pad(features, ((0, Bp - B), (0, 0)))
        captions = jnp.pad(captions, ((0, Bp - B), (0, 0)))   # token 0: valid row

    # --- embedding lookup, gathered directly in time-major layout ------------
    # nn.Dropout(0.5): eval-mode identity.
    emb_tm = jnp.take(params["embed"], captions.T, axis=0)    # (T, Bp, E)
    x_flat = emb_tm.reshape(T * Bp, E)                         # no transpose op

    # --- Kernel A: hoisted input projection for all timesteps ----------------
    pre = input_proj_forward(x_flat.astype(matmul_dtype),
                             w_ih_t.astype(matmul_dtype),
                             out_dtype=matmul_dtype)           # (T*Bp, 4H)
    pre_tb = pre.reshape(T, Bp, G)                             # metadata reshape

    # --- features term fused via distributivity, precomputed ONCE (tiny) -----
    #   (emb_t + feat) @ W_ih^T + b  ==  pre[t] + (feat @ W_ih^T + b)
    base = (features @ w_ih_t + b_lstm).astype(jnp.float32)    # (Bp, 4H)

    # --- Kernel B: streamed LSTM recurrence over the (batch, time) grid ------
    h_tbh = lstm_recurrence(pre_tb, base, w_hh_t.astype(matmul_dtype),
                            out_dtype=matmul_dtype)            # (T, Bp, H)

    # --- pack_padded_sequence row selection BEFORE the vocab matmul ----------
    # (row-wise linear commutes with the gather; saves the dead-row FLOPs and
    #  the (T*B, V) logits writeback)
    idx = np.array(
        [t * Bp + b for t in range(T) for b in range(B) if lengths[b] > t],
        dtype=np.int32)
    h_packed = jnp.take(h_tbh.reshape(T * Bp, H), jnp.asarray(idx), axis=0)

    # --- Kernel C: tiled vocab projection over the packed rows only ----------
    return linear_forward(h_packed, w_lin_t.astype(matmul_dtype),
                          params["b_lin"])


# ----------------------------------------------------------------------------
# Pure-JAX reference (correctness check only)
# ----------------------------------------------------------------------------
def reference_forward(params, features, captions, lengths):
    B, T = captions.shape
    H = params["w_hh"].shape[1]
    emb = jnp.take(params["embed"], captions, axis=0) + features[:, None, :]
    x_tbe = jnp.transpose(emb, (1, 0, 2))

    def step(carry, x_t):
        h, c = carry
        gates = x_t @ params["w_ih"].T + h @ params["w_hh"].T + params["b_lstm"][0]
        i = jax.nn.sigmoid(gates[:, 0:H])
        f = jax.nn.sigmoid(gates[:, H:2 * H])
        g = jnp.tanh(gates[:, 2 * H:3 * H])
        o = jax.nn.sigmoid(gates[:, 3 * H:4 * H])
        c = f * c + i * g
        h = o * jnp.tanh(c)
        return (h, c), h

    init = (jnp.zeros((B, H)), jnp.zeros((B, H)))
    _, h_tbh = jax.lax.scan(step, init, x_tbe)
    idx = np.array(
        [t * B + b for t in range(T) for b in range(B) if lengths[b] > t],
        dtype=np.int32)
    h_packed = h_tbh.reshape(T * B, H)[jnp.asarray(idx)]
    return h_packed @ params["w_lin"].T + params["b_lin"][0]


# ----------------------------------------------------------------------------
if __name__ == "__main__":
    # hidden=128 / vocab=256 keep gate slices and all stores lane-dense.
    embed_size, hidden_size, vocab_size, num_layers = 64, 128, 256, 1
    B, T = 4, 8
    lengths = [8, 6, 5, 3]   # sorted descending (enforce_sorted=True)

    key = jax.random.PRNGKey(0)
    ks = jax.random.split(key, 8)
    scale = 1.0 / np.sqrt(hidden_size)

    params = {
        "embed": jax.random.normal(ks[0], (vocab_size, embed_size), jnp.float32) * 0.1,
        "w_ih": jax.random.uniform(ks[1], (4 * hidden_size, embed_size),
                                   jnp.float32, -scale, scale),
        "w_hh": jax.random.uniform(ks[2], (4 * hidden_size, hidden_size),
                                   jnp.float32, -scale, scale),
        # b_ih + b_hh folded into a single (1, 4H) bias.
        "b_lstm": (jax.random.uniform(ks[3], (1, 4 * hidden_size), jnp.float32, -scale, scale)
                   + jax.random.uniform(ks[4], (1, 4 * hidden_size), jnp.float32, -scale, scale)),
        "w_lin": jax.random.uniform(ks[5], (vocab_size, hidden_size),
                                    jnp.float32, -scale, scale),
        "b_lin": jax.random.uniform(ks[6], (1, vocab_size), jnp.float32, -scale, scale),
    }

    features = jax.random.normal(ks[7], (B, embed_size), jnp.float32)
    captions = jax.random.randint(jax.random.PRNGKey(1), (B, T), 0, vocab_size, jnp.int32)

    ref = jax.block_until_ready(reference_forward(params, features, captions, lengths))

    # f32 path: verifies kernel structure against the PyTorch math (tight tol).
    out_f32 = jax.block_until_ready(
        decoder_rnn_forward(params, features, captions, lengths,
                            matmul_dtype=jnp.float32))
    assert out_f32.shape == (sum(lengths), vocab_size), out_f32.shape
    np.testing.assert_allclose(np.asarray(out_f32), np.asarray(ref),
                               atol=1e-3, rtol=1e-3)

    # Production path: bf16 matmul operands + bf16 pre/h, f32 accumulation
    # (v6e/v7x MXU-native); looser tolerance vs the f32 reference.
    out_bf16 = jax.block_until_ready(
        decoder_rnn_forward(params, features, captions, lengths,
                            matmul_dtype=jnp.bfloat16))
    assert out_bf16.shape == (sum(lengths), vocab_size), out_bf16.shape
    np.testing.assert_allclose(np.asarray(out_bf16), np.asarray(ref),
                               atol=5e-2, rtol=5e-2)

    print("KERNEL_OK")
</pallas_src>

<mosaic_0001>
module attributes {stable_mosaic.version = 11 : i64} {
  func.func @_input_proj_kernel(%arg0: i32, %arg1: memref<64x64xf32, #tpu.memory_space<vmem>>, %arg2: memref<64x512xf32, #tpu.memory_space<vmem>>, %arg3: memref<64x512xf32, #tpu.memory_space<vmem>>) attributes {dimension_semantics = [#tpu.dimension_semantics<parallel>], iteration_bounds = array<i64: 1>, scalar_prefetch = 0 : i64, scratch_operands = 0 : i64, tpu.core_type = #tpu.core_type<tc>, window_params = [{transform_indices = @transform_0, window_bounds = array<i64: 64, 64>}, {pipeline_mode = #tpu.pipeline_mode<synchronous>, transform_indices = @transform_1, window_bounds = array<i64: 64, 512>}, {transform_indices = @transform_2, window_bounds = array<i64: 64, 512>}]} {
    %c0 = arith.constant 0 : index
    %c0_0 = arith.constant 0 : index
    %0 = vector.load %arg1[%c0, %c0_0] : memref<64x64xf32, #tpu.memory_space<vmem>>, vector<64x64xf32>
    %c0_1 = arith.constant 0 : index
    %c0_2 = arith.constant 0 : index
    %1 = vector.load %arg2[%c0_1, %c0_2] : memref<64x512xf32, #tpu.memory_space<vmem>>, vector<64x512xf32>
    %cst = arith.constant dense<0.000000e+00> : vector<64x512xf32>
    %2 = tpu.matmul %0, %1, %cst {dimension_numbers = #tpu.dot_dimension_numbers<[1], [0], [0], [1], [0, 0, 1, 1], [], []>} : vector<64x64xf32>, vector<64x512xf32>, vector<64x512xf32> -> vector<64x512xf32>
    %c0_3 = arith.constant 0 : index
    %c0_4 = arith.constant 0 : index
    %3 = vector.load %arg3[%c0_3, %c0_4] : memref<64x512xf32, #tpu.memory_space<vmem>>, vector<64x512xf32>
    tpu.vector_store %arg3[%c0_3, %c0_4], %2 {strides = array<i32>} : memref<64x512xf32, #tpu.memory_space<vmem>>, vector<64x512xf32>,
    return
  }
  func.func @transform_0(%arg0: i32) -> (i32, i32) {
    %c0_i32 = arith.constant 0 : i32
    %c0_i32_0 = arith.constant 0 : i32
    return %arg0, %c0_i32 : i32, i32
  }
  func.func @transform_1(%arg0: i32) -> (i32, i32) {
    %c0_i32 = arith.constant 0 : i32
    %c0_i32_0 = arith.constant 0 : i32
    %c0_i32_1 = arith.constant 0 : i32
    return %c0_i32, %c0_i32_0 : i32, i32
  }
  func.func @transform_2(%arg0: i32) -> (i32, i32) {
    %c0_i32 = arith.constant 0 : i32
    %c0_i32_0 = arith.constant 0 : i32
    return %arg0, %c0_i32 : i32, i32
  }
}

</mosaic_0001>

<bundles_post_ra>
// kernel: tpu_custom_call.1
= control target key start
LH: loop header
LB: loop body
LE: loop exit
PB: predicated region body
PF: predicated region fallthrough
CT: control target
= control target key end

     0   :  { %7 = vsyncpa [#allocation3], 0  ;;  %s541_s0 = inlined_call_operand.hbm [shape: f32[64,64], index: 0, kind: input, shape index: {}]   ;;  %s542_s1 = inlined_call_operand.hbm [shape: f32[64,512], index: 1, kind: input, shape index: {}]   ;;  %s543_s2 = inlined_call_operand.hbm [shape: f32[64,512], index: 2, kind: output, shape index: {}]  }
   0x1   :  { %8 = vsyncpa [#allocation6], 0 }
   0x2   :  { %9 = vsyncpa [#allocation4], 0  ;;  %s471_s9 = smov [#allocation2]  }
   0x3   :  { %s15_s10 = sshll.u32 %s471_s9, 4  ;;  %s16_s10 = int_to_ptr.vmem [resolvable:$true] %s15_s10 }
   0x4   :  { %s413_s11 = scalar_lea.vmem %s16_s10, 1024  ;;  %p418_p1 = scmp.lt.s32.totalorder %s16_s10, %s16_s10 }
   0x5   :  { %p414_p0 = scmp.ne.s32.totalorder %s16_s10, %s413_s11  ;;  %p419_p2 = scmp.lt.s32.totalorder %s413_s11, %s413_s11 }
   0x7   :  { %p420_p3 = por %p419_p2, %p418_p1 }
   0x9   :  { %p421_p4 = pnand %p420_p3, %p414_p0 }
   0xb   :  { %424 = shalt.err (!%p421_p4)
}
   0xc   :  { %s472_s12 = smov 128   ;;  %s473_s13 = smov 8  }
   0xd   :  { %21 = dma.hbm_to_vmem [thread:$0]  %s541_s0, 1024, %s16_s10, [#allocation3], %s472_s12, %s472_s12, %s473_s13  }
   0xe   :  { %s474_s16 = smov [#allocation5]  }
   0xf   :  { %s27_s17 = sshll.u32 %s474_s16, 4  ;;  %s28_s17 = int_to_ptr.vmem [resolvable:$true] %s27_s17 }
  0x10   :  { %s433_s18 = scalar_lea.vmem %s28_s17, 4096  ;;  %p438_p6 = scmp.lt.s32.totalorder %s28_s17, %s28_s17 }
  0x11   :  { %p434_p5 = scmp.ne.s32.totalorder %s28_s17, %s433_s18  ;;  %p439_p7 = scmp.lt.s32.totalorder %s433_s18, %s433_s18 }
  0x13   :  { %p440_p8 = por %p439_p7, %p438_p6 }
  0x15   :  { %p441_p9 = pnand %p440_p8, %p434_p5 }
  0x17   :  { %444 = shalt.err (!%p441_p9)
}
  0x18   :  { %s475_s19 = smov 512   ;;  %s476_s20 = smov 32  }
  0x19   :  { %33 = dma.hbm_to_vmem [thread:$0]  %s542_s1, 4096, %s28_s17, [#allocation6], %s475_s19, %s475_s19, %s476_s20  }
  0x1a   :  { %465 = dma.done.wait [#allocation3], 1024  }
  0x1b   :  { %466 = vsyncadd [#allocation3], 4294966272 }
  0x1c   :  { %467 = dma.done.wait [#allocation6], 4096  }
  0x1d   :  { %468 = vsyncadd [#allocation6], 4294963200  ;;  %v477_v0 = vmov 0.0   ;;  %v77_v1 = vld [vmem:[#allocation5 + $0xe8] sm:$0xff]  ;;  %v79_v2 = vld [vmem:[#allocation5 + $0xf8] sm:$0xff]  ;;  %vm80_vm0 = vcmask 523264  }
  0x1e   :  { %169 = vmatprep.mubr.f32.mxu0 %v477_v0  ;;  %282 = vmatprep.mubr.f32.mxu1 %v477_v0  ;;  %v76_v3 = vld [vmem:[#allocation5 + $0xe0] sm:$0xff]  ;;  %v78_v4 = vld [vmem:[#allocation5 + $0xf0] sm:$0xff]  ;;  %v73_v5 = vld [vmem:[#allocation5 + $0xc8] sm:$0xff]  ;;  %s478_s0 = smov [#allocation7]  }
  0x1f   :  { %121 = vmatprep.subr.mxu0 %v77_v1  ;;  %234 = vmatprep.subr.mxu1 %v79_v2  ;;  %v75_v6 = vld [vmem:[#allocation5 + $0xd8] sm:$0xff]  ;;  %v72_v7 = vld [vmem:[#allocation5 + $0xc0] sm:$0xff]  ;;  %v74_v8 = vld [vmem:[#allocation5 + $0xd0] sm:$0xff]  ;;  %s368_s1 = sshll.u32 %s478_s0, 4  ;;  %s369_s1 = int_to_ptr.vmem [resolvable:$true] %s368_s1 }
  0x20   :  { %122 = vmatpush1.msra.mxu0 %v76_v3  ;;  %235 = vmatpush1.msra.mxu1 %v78_v4  ;;  %v69_v9 = vld [vmem:[#allocation5 + $0xa8] sm:$0xff]  ;;  %v71_v10 = vld [vmem:[#allocation5 + $0xb8] sm:$0xff]  ;;  %v68_v11 = vld [vmem:[#allocation5 + $0xa0] sm:$0xff]  ;;  %s445_s23 = scalar_lea.vmem %s369_s1, 4096  ;;  %p450_p11 = scmp.lt.s32.totalorder %s369_s1, %s369_s1 }
  0x21   :  { %123 = vmatprep.subr.mxu0 %v73_v5  ;;  %236 = vmatprep.subr.mxu1 %v75_v6  ;;  %v70_v12 = vld [vmem:[#allocation5 + $0xb0] sm:$0xff]  ;;  %v65_v13 = vld [vmem:[#allocation5 + $0x88] sm:$0xff]  ;;  %v67_v14 = vld [vmem:[#allocation5 + $0x98] sm:$0xff]  ;;  %p446_p10 = scmp.ne.s32.totalorder %s369_s1, %s445_s23  ;;  %p451_p12 = scmp.lt.s32.totalorder %s445_s23, %s445_s23 }
  0x22   :  { %124 = vmatpush1.msra.mxu0 %v72_v7  ;;  %237 = vmatpush1.msra.mxu1 %v74_v8  ;;  %v64_v15 = vld [vmem:[#allocation5 + $0x80] sm:$0xff]  ;;  %v66_v16 = vld [vmem:[#allocation5 + $0x90] sm:$0xff]  ;;  %v61_v17 = vld [vmem:[#allocation5 + $0x68] sm:$0xff] }
  0x23   :  { %125 = vmatprep.subr.mxu0 %v69_v9  ;;  %238 = vmatprep.subr.mxu1 %v71_v10  ;;  %v63_v18 = vld [vmem:[#allocation5 + $0x78] sm:$0xff]  ;;  %v60_v19 = vld [vmem:[#allocation5 + $0x60] sm:$0xff]  ;;  %v62_v20 = vld [vmem:[#allocation5 + $0x70] sm:$0xff]  ;;  %p452_p13 = por %p451_p12, %p450_p11 }
  0x24   :  { %126 = vmatpush1.msra.mxu0 %v68_v11  ;;  %239 = vmatpush1.msra.mxu1 %v70_v12  ;;  %v57_v21 = vld [vmem:[#allocation5 + $0x48] sm:$0xff]  ;;  %v59_v22 = vld [vmem:[#allocation5 + $0x58] sm:$0xff]  ;;  %v56_v23 = vld [vmem:[#allocation5 + $0x40] sm:$0xff] }
  0x25   :  { %127 = vmatprep.subr.mxu0 %v65_v13  ;;  %240 = vmatprep.subr.mxu1 %v67_v14  ;;  %v58_v24 = vld [vmem:[#allocation5 + $0x50] sm:$0xff]  ;;  %v53_v25 = vld [vmem:[#allocation5 + $0x28] sm:$0xff]  ;;  %v55_v26 = vld [vmem:[#allocation5 + $0x38] sm:$0xff]  ;;  %p453_p0 = pnand %p452_p13, %p446_p10 }
  0x26   :  { %128 = vmatpush1.msra.mxu0 %v64_v15  ;;  %241 = vmatpush1.msra.mxu1 %v66_v16  ;;  %v52_v27 = vld [vmem:[#allocation5 + $0x20] sm:$0xff]  ;;  %v54_v28 = vld [vmem:[#allocation5 + $0x30] sm:$0xff]  ;;  %v49_v29 = vld [vmem:[#allocation5 + $0x8] sm:$0xff] }
  0x27   :  { %129 = vmatprep.subr.mxu0 %v61_v17  ;;  %242 = vmatprep.subr.mxu1 %v63_v18  ;;  %v51_v30 = vld [vmem:[#allocation5 + $0x18] sm:$0xff]  ;;  %v48_v31 = vld [vmem:[#allocation5] sm:$0xff]  ;;  %v50_v32 = vld [vmem:[#allocation5 + $0x10] sm:$0xff] }
  0x28   :  { %130 = vmatpush1.msra.mxu0 %v60_v19  ;;  %243 = vmatpush1.msra.mxu1 %v62_v20  ;;  %v40_v33 = vld [vmem:[#allocation2] sm:$0xff]  ;;  %v41_v34 = vld [vmem:[#allocation2 + $0x8] sm:$0xff]  ;;  %v42_v35 = vld [vmem:[#allocation2 + $0x10] sm:$0xff] }
  0x29   :  { %131 = vmatprep.subr.mxu0 %v57_v21  ;;  %244 = vmatprep.subr.mxu1 %v59_v22  ;;  %v43_v36 = vld [vmem:[#allocation2 + $0x18] sm:$0xff]  ;;  %v44_v37 = vld [vmem:[#allocation2 + $0x20] sm:$0xff]  ;;  %v45_v38 = vld [vmem:[#allocation2 + $0x28] sm:$0xff] }
  0x2a   :  { %132 = vmatpush1.msra.mxu0 %v56_v23  ;;  %245 = vmatpush1.msra.mxu1 %v58_v24  ;;  %v46_v39 = vld [vmem:[#allocation2 + $0x30] sm:$0xff]  ;;  %v47_v40 = vld [vmem:[#allocation2 + $0x38] sm:$0xff] }
  0x2b   :  { %133 = vmatprep.subr.mxu0 %v53_v25  ;;  %246 = vmatprep.subr.mxu1 %v55_v26 }
  0x2c   :  { %134 = vmatpush1.msra.mxu0 %v52_v27  ;;  %247 = vmatpush1.msra.mxu1 %v54_v28 }
  0x2d   :  { %135 = vmatprep.subr.mxu0 %v49_v29  ;;  %248 = vmatprep.subr.mxu1 %v51_v30 }
  0x2e   :  { %136 = vmatpush1.msra.mxu0 %v48_v31  ;;  %249 = vmatpush1.msra.mxu1 %v50_v32 }
  0x2f   :  { %381 = vmatmul.mubr.msk.f32.vlgmr.msra.gmra.mxu0 %vm80_vm0, %v40_v33  ;;  %389 = vmatmul.mubr.msk.f32.vlgmr.msra.gmra.mxu1 %vm80_vm0, %v40_v33 }
  0x30   :  { %175 = vmatprep.mubr.f32.mxu0 %v477_v0  ;;  %288 = vmatprep.mubr.f32.mxu1 %v477_v0 }
  0x33   :  { %382 = vmatmul.mubr.msk.f32.gmra.mxu0 %vm80_vm0, %v41_v34  ;;  %390 = vmatmul.mubr.msk.f32.gmra.mxu1 %vm80_vm0, %v41_v34 }
  0x34   :  { %181 = vmatprep.mubr.f32.mxu0 %v477_v0  ;;  %294 = vmatprep.mubr.f32.mxu1 %v477_v0 }
  0x37   :  { %383 = vmatmul.mubr.msk.f32.gmra.mxu0 %vm80_vm0, %v42_v35  ;;  %391 = vmatmul.mubr.msk.f32.gmra.mxu1 %vm80_vm0, %v42_v35 }
  0x38   :  { %187 = vmatprep.mubr.f32.mxu0 %v477_v0  ;;  %300 = vmatprep.mubr.f32.mxu1 %v477_v0 }
  0x3b   :  { %384 = vmatmul.mubr.msk.f32.gmra.mxu0 %vm80_vm0, %v43_v36  ;;  %392 = vmatmul.mubr.msk.f32.gmra.mxu1 %vm80_vm0, %v43_v36 }
  0x3c   :  { %193 = vmatprep.mubr.f32.mxu0 %v477_v0  ;;  %306 = vmatprep.mubr.f32.mxu1 %v477_v0 }
  0x3f   :  { %385 = vmatmul.mubr.msk.f32.gmra.mxu0 %vm80_vm0, %v44_v37  ;;  %393 = vmatmul.mubr.msk.f32.gmra.mxu1 %vm80_vm0, %v44_v37 }
  0x40   :  { %199 = vmatprep.mubr.f32.mxu0 %v477_v0  ;;  %312 = vmatprep.mubr.f32.mxu1 %v477_v0 }
  0x43   :  { %386 = vmatmul.mubr.msk.f32.gmra.mxu0 %vm80_vm0, %v45_v38  ;;  %394 = vmatmul.mubr.msk.f32.gmra.mxu1 %vm80_vm0, %v45_v38 }
  0x44   :  { %205 = vmatprep.mubr.f32.mxu0 %v477_v0  ;;  %318 = vmatprep.mubr.f32.mxu1 %v477_v0 }
  0x47   :  { %387 = vmatmul.mubr.msk.f32.gmra.mxu0 %vm80_vm0, %v46_v39  ;;  %395 = vmatmul.mubr.msk.f32.gmra.mxu1 %vm80_vm0, %v46_v39 }
  0x48   :  { %211 = vmatprep.mubr.f32.mxu0 %v477_v0  ;;  %324 = vmatprep.mubr.f32.mxu1 %v477_v0 }
  0x4b   :  { %388 = vmatmul.mubr.msk.f32.gmra.mxu0 %vm80_vm0, %v47_v40  ;;  %396 = vmatmul.mubr.msk.f32.gmra.mxu1 %vm80_vm0, %v47_v40 }
  0xef   :  { %v171_v41 = vpop.f32.mrf.mxu0  ;;  %v284_v42 = vpop.f32.mrf.mxu1 }
  0xf0   :  { %331 = vst [vmem:[#allocation7] sm:$0xff] %v171_v41  ;;  %333 = vst [vmem:[#allocation7 + $0x10] sm:$0xff] %v284_v42 }
  0xf1   :  { %v173_v43 = vpop.f32.mrf.mxu0  ;;  %v286_v44 = vpop.f32.mrf.mxu1 }
  0xf2   :  { %332 = vst [vmem:[#allocation7 + $0x8] sm:$0xff] %v173_v43  ;;  %334 = vst [vmem:[#allocation7 + $0x18] sm:$0xff] %v286_v44 }
  0xf3   :  { %v177_v45 = vpop.f32.mrf.mxu0  ;;  %v290_v46 = vpop.f32.mrf.mxu1 }
  0xf4   :  { %335 = vst [vmem:[#allocation7 + $0x20] sm:$0xff] %v177_v45  ;;  %337 = vst [vmem:[#allocation7 + $0x30] sm:$0xff] %v290_v46 }
  0xf5   :  { %v179_v47 = vpop.f32.mrf.mxu0  ;;  %v292_v48 = vpop.f32.mrf.mxu1 }
  0xf6   :  { %336 = vst [vmem:[#allocation7 + $0x28] sm:$0xff] %v179_v47  ;;  %338 = vst [vmem:[#allocation7 + $0x38] sm:$0xff] %v292_v48 }
  0xf7   :  { %v183_v49 = vpop.f32.mrf.mxu0  ;;  %v296_v50 = vpop.f32.mrf.mxu1 }
  0xf8   :  { %339 = vst [vmem:[#allocation7 + $0x40] sm:$0xff] %v183_v49  ;;  %341 = vst [vmem:[#allocation7 + $0x50] sm:$0xff] %v296_v50 }
  0xf9   :  { %v185_v51 = vpop.f32.mrf.mxu0  ;;  %v298_v52 = vpop.f32.mrf.mxu1 }
  0xfa   :  { %340 = vst [vmem:[#allocation7 + $0x48] sm:$0xff] %v185_v51  ;;  %342 = vst [vmem:[#allocation7 + $0x58] sm:$0xff] %v298_v52 }
  0xfb   :  { %v189_v53 = vpop.f32.mrf.mxu0  ;;  %v302_v54 = vpop.f32.mrf.mxu1 }
  0xfc   :  { %343 = vst [vmem:[#allocation7 + $0x60] sm:$0xff] %v189_v53  ;;  %345 = vst [vmem:[#allocation7 + $0x70] sm:$0xff] %v302_v54 }
  0xfd   :  { %v191_v55 = vpop.f32.mrf.mxu0  ;;  %v304_v56 = vpop.f32.mrf.mxu1 }
  0xfe   :  { %344 = vst [vmem:[#allocation7 + $0x68] sm:$0xff] %v191_v55  ;;  %346 = vst [vmem:[#allocation7 + $0x78] sm:$0xff] %v304_v56 }
  0xff   :  { %v195_v57 = vpop.f32.mrf.mxu0  ;;  %v308_v58 = vpop.f32.mrf.mxu1 }
 0x100   :  { %347 = vst [vmem:[#allocation7 + $0x80] sm:$0xff] %v195_v57  ;;  %349 = vst [vmem:[#allocation7 + $0x90] sm:$0xff] %v308_v58 }
 0x101   :  { %v197_v59 = vpop.f32.mrf.mxu0  ;;  %v310_v60 = vpop.f32.mrf.mxu1 }
 0x102   :  { %348 = vst [vmem:[#allocation7 + $0x88] sm:$0xff] %v197_v59  ;;  %350 = vst [vmem:[#allocation7 + $0x98] sm:$0xff] %v310_v60 }
 0x103   :  { %v201_v61 = vpop.f32.mrf.mxu0  ;;  %v314_v62 = vpop.f32.mrf.mxu1 }
 0x104   :  { %351 = vst [vmem:[#allocation7 + $0xa0] sm:$0xff] %v201_v61  ;;  %353 = vst [vmem:[#allocation7 + $0xb0] sm:$0xff] %v314_v62 }
 0x105   :  { %v203_v63 = vpop.f32.mrf.mxu0  ;;  %v316_v0 = vpop.f32.mrf.mxu1 }
 0x106   :  { %352 = vst [vmem:[#allocation7 + $0xa8] sm:$0xff] %v203_v63  ;;  %354 = vst [vmem:[#allocation7 + $0xb8] sm:$0xff] %v316_v0 }
 0x107   :  { %v207_v1 = vpop.f32.mrf.mxu0  ;;  %v320_v2 = vpop.f32.mrf.mxu1 }
 0x108   :  { %355 = vst [vmem:[#allocation7 + $0xc0] sm:$0xff] %v207_v1  ;;  %357 = vst [vmem:[#allocation7 + $0xd0] sm:$0xff] %v320_v2 }
 0x109   :  { %v209_v3 = vpop.f32.mrf.mxu0  ;;  %v322_v4 = vpop.f32.mrf.mxu1 }
 0x10a   :  { %356 = vst [vmem:[#allocation7 + $0xc8] sm:$0xff] %v209_v3  ;;  %358 = vst [vmem:[#allocation7 + $0xd8] sm:$0xff] %v322_v4 }
 0x10b   :  { %v213_v5 = vpop.f32.mrf.mxu0  ;;  %v326_v6 = vpop.f32.mrf.mxu1 }
 0x10c   :  { %359 = vst [vmem:[#allocation7 + $0xe0] sm:$0xff] %v213_v5  ;;  %361 = vst [vmem:[#allocation7 + $0xf0] sm:$0xff] %v326_v6 }
 0x10d   :  { %v215_v7 = vpop.f32.mrf.mxu0  ;;  %v328_v8 = vpop.f32.mrf.mxu1 }
 0x10e   :  { %360 = vst [vmem:[#allocation7 + $0xe8] sm:$0xff] %v215_v7  ;;  %362 = vst [vmem:[#allocation7 + $0xf8] sm:$0xff] %v328_v8 }
 0x10f   :  { %456 = shalt.err (!%p453_p0)
}
 0x110   :  { %374 = dma.vmem_to_hbm [thread:$0]  %s369_s1, 4096, %s543_s2, [#allocation4], %s475_s19, %s475_s19, %s476_s20  }
 0x111   :  { %469 = dma.done.wait [#allocation4], 4096  }
 0x112   :  { %470 = vsyncadd [#allocation4], 4294963200 }
 0x113   :  { %378 = vsyncpa [#allocation3], 1 }
 0x114   :  { %379 = vsyncpa [#allocation6], 1 }
 0x115   :  { %380 = vsyncpa [#allocation4], 1 }

</bundles_post_ra>
